<compile_context>
chip_gen: v7x
topology: tpu7x:2x2x1
jax: 0.10.0
libtpu: 0.0.40
codegen_flags: <defaults>
</compile_context>

<pallas_src>
import jax
import jax.numpy as jnp
from jax.experimental import pallas as pl
from jax.experimental.pallas import tpu as pltpu


def _round_up(a, m):
    return ((a + m - 1) // m) * m


def _vmem_capacity_bytes():
    try:
        return int(pltpu.get_tpu_info().vmem_capacity_bytes)
    except Exception:
        return 64 * 1024 * 1024          # v7x-safe fallback


def _pick_tile_hw(hw, batch, c1, ce_pad, itemsize, vmem_budget_bytes,
                  max_tile=8192, min_steps=8):
    """Lane-dense spatial tile sized against the VMEM budget."""
    hw128 = _round_up(hw, 128)
    # double-buffered input + output blocks (auto-pipelined) + f32 product scratch
    bytes_per_lane = 2 * (c1 + (c1 + ce_pad)) * itemsize + ce_pad * 4
    tile = (vmem_budget_bytes // max(bytes_per_lane, 1)) // 128 * 128
    tile = int(max(128, min(tile, max_tile, hw128)))
    # keep enough pipelined grid steps so both v7x TensorCores stay busy
    while tile > 512 and batch * pl.cdiv(hw128, tile) < min_steps:
        tile -= 128
    return tile


def _make_kernel(c1, ce, ce_pad):
    two_ce = 2 * ce

    def kernel(sel_ref, scale_ref, bias_ref, x_ref, out_ref, prod_ref):
        b = pl.program_id(0)
        base = b * two_ce

        # Pass-through of x into the first c1 output channels (the concat).
        out_ref[0, :c1, :] = x_ref[0]

        # Gather each (i, j) row pair and write the raw Hadamard product into
        # a sublane-dense f32 scratch.  Only one row pair live in vregs.
        def gather_one(c):
            i_idx = sel_ref[base + c]                 # SMEM scalar reads
            j_idx = sel_ref[base + ce + c]
            xi = x_ref[0, pl.ds(i_idx, 1), :].astype(jnp.float32)   # (1, TILE)
            xj = x_ref[0, pl.ds(j_idx, 1), :].astype(jnp.float32)   # (1, TILE)
            prod_ref[pl.ds(c, 1), :] = xi * xj

        if ce <= 32:                                  # small CE: cheap unroll
            for c in range(ce):
                gather_one(c)
        else:                                         # large CE: bounded codegen
            def body(c, carry):
                gather_one(c)
                return carry
            jax.lax.fori_loop(0, ce, body, 0)

        # ONE dense fused eval-BN affine (scale/bias broadcast once per step)
        # and a single contiguous store of all expansion channels.
        xe = prod_ref[...] * scale_ref[...] + bias_ref[...]         # (ce_pad, TILE)
        out_ref[0, c1:c1 + ce, :] = xe[:ce].astype(out_ref.dtype)

    return kernel


def adaptive_cross_hadamard_eval(x_nchw, sel_i_idx, sel_j_idx,
                                 gamma, beta, run_mean, run_var, eps=1e-5):
    """Eval-mode channel gather + pairwise Hadamard + BN(eval) + channel concat.

    sel_i_idx / sel_j_idx: (B, CE) int channel indices per batch, already
    expanded from the per-batch top-k selection via the (hadamard_i, hadamard_j)
    pair enumeration.
    """
    B, C1, H, W = x_nchw.shape
    CE = int(sel_i_idx.shape[-1])
    CE_pad = _round_up(max(CE, 1), 8)
    HW = H * W
    x = x_nchw.reshape(B, C1, HW)
    itemsize = jnp.dtype(x.dtype).itemsize

    # Generation-aware VMEM budgeting (v7x: 64 MiB physical; v5e/v6e: 128 MiB).
    vmem_cap = _vmem_capacity_bytes()
    vmem_budget = max(min(vmem_cap // 2 - (8 << 20), 48 << 20), 8 << 20)
    tile_hw = _pick_tile_hw(HW, B, C1, CE_pad, itemsize, vmem_budget)
    n_hw = pl.cdiv(HW, tile_hw)                 # ragged tail masked by Pallas
    vmem_limit = int(min((vmem_cap * 3) // 4, vmem_budget + (16 << 20)))

    # Fold eval-mode BatchNorm2d into per-channel scale / bias (padded to 8 rows).
    inv = (gamma / jnp.sqrt(run_var + eps)).astype(jnp.float32)
    scale = jnp.zeros((CE_pad, 1), jnp.float32).at[:CE, 0].set(inv)
    bias = jnp.zeros((CE_pad, 1), jnp.float32).at[:CE, 0].set(
        (beta - run_mean * inv).astype(jnp.float32))

    # Flat 1-D int32 index array for SMEM scalar prefetch: [i(0..CE), j(0..CE)] per batch.
    sel_flat = jnp.concatenate(
        [sel_i_idx.astype(jnp.int32).reshape(B, CE),
         sel_j_idx.astype(jnp.int32).reshape(B, CE)], axis=1).reshape(-1)

    kernel = _make_kernel(C1, CE, CE_pad)
    out = pl.pallas_call(
        kernel,
        out_shape=jax.ShapeDtypeStruct((B, C1 + CE, HW), x.dtype),
        grid_spec=pltpu.PrefetchScalarGridSpec(
            num_scalar_prefetch=1,                      # sel_flat -> SMEM
            grid=(B, n_hw),
            in_specs=[
                pl.BlockSpec((CE_pad, 1), lambda b, t, sel: (0, 0)),   # BN scale
                pl.BlockSpec((CE_pad, 1), lambda b, t, sel: (0, 0)),   # BN bias
                pl.BlockSpec((1, C1, tile_hw),
                             lambda b, t, sel: (b, 0, t)),             # x tile
            ],
            out_specs=pl.BlockSpec((1, C1 + CE, tile_hw),
                                   lambda b, t, sel: (b, 0, t)),
            scratch_shapes=[pltpu.VMEM((CE_pad, tile_hw), jnp.float32)],
        ),
        compiler_params=pltpu.CompilerParams(
            dimension_semantics=("parallel", "parallel"),
            vmem_limit_bytes=vmem_limit),
    )(sel_flat, scale, bias, x)

    return out.reshape(B, C1 + CE, H, W)


if __name__ == "__main__":
    key = jax.random.PRNGKey(0)
    B, c1, H, W = 2, 8, 16, 16
    cs = 4
    cs_expand = cs * (cs - 1) // 2          # 6 expansion channels
    eps = 1e-5

    # hadamard_i / hadamard_j pair enumeration (same order as the module buffers)
    pairs = [(i, j) for i in range(cs) for j in range(i + 1, cs)]
    hadamard_i = jnp.array([p[0] for p in pairs], jnp.int32)
    hadamard_j = jnp.array([p[1] for p in pairs], jnp.int32)

    ks = jax.random.split(key, 12)
    x_in = jax.random.normal(ks[0], (B, c1, H, W), dtype=jnp.float32)

    # --- upstream glue (plain JAX, eval mode): fc (1x1 conv) + norm_x BN(eval) ---
    w_fc = 0.3 * jax.random.normal(ks[1], (c1, c1), dtype=jnp.float32)
    b_fc = 0.1 * jax.random.normal(ks[2], (c1,), dtype=jnp.float32)
    g_x = 1.0 + 0.1 * jax.random.normal(ks[3], (c1,), dtype=jnp.float32)
    b_x = 0.1 * jax.random.normal(ks[4], (c1,), dtype=jnp.float32)
    m_x = 0.1 * jax.random.normal(ks[5], (c1,), dtype=jnp.float32)
    v_x = jnp.abs(1.0 + 0.1 * jax.random.normal(ks[6], (c1,), dtype=jnp.float32))
    y = jnp.einsum('oc,bchw->bohw', w_fc, x_in) + b_fc[None, :, None, None]
    x_feat = ((y - m_x[None, :, None, None])
              * (g_x / jnp.sqrt(v_x + eps))[None, :, None, None]
              + b_x[None, :, None, None])

    # --- eva_net (ECA) stand-in: GAP -> 1D conv (k=5, same padding) -> sigmoid ---
    # TODO(synk): exact ECA internals are not in the provided spec; any per-batch
    # channel-logit producer works here (kernel and reference share its output).
    w_eca = 0.5 * jax.random.normal(ks[7], (5,), dtype=jnp.float32)
    pooled = x_feat.mean(axis=(2, 3))                                # (B, c1)
    padded = jnp.pad(pooled, ((0, 0), (2, 2)))
    logits = jax.nn.sigmoid(sum(w_eca[k] * padded[:, k:k + c1] for k in range(5)))

    # --- eval path: per-batch top-cs channels, expanded to all (i<j) pairs ---
    _, topk_idx = jax.lax.top_k(logits, cs)                          # (B, cs)
    sel_i_idx = topk_idx[:, hadamard_i]                              # (B, cs_expand)
    sel_j_idx = topk_idx[:, hadamard_j]

    # --- self.norm: BatchNorm2d(cs_expand), eval-mode params / running stats ---
    g_e = 1.0 + 0.1 * jax.random.normal(ks[8], (cs_expand,), dtype=jnp.float32)
    b_e = 0.1 * jax.random.normal(ks[9], (cs_expand,), dtype=jnp.float32)
    m_e = 0.1 * jax.random.normal(ks[10], (cs_expand,), dtype=jnp.float32)
    v_e = jnp.abs(1.0 + 0.1 * jax.random.normal(ks[11], (cs_expand,), dtype=jnp.float32))

    out = adaptive_cross_hadamard_eval(x_feat, sel_i_idx, sel_j_idx,
                                       g_e, b_e, m_e, v_e, eps=eps)
    out = jax.block_until_ready(out)

    # --- pure-JAX reference of the eval-mode gather / hadamard / norm / concat ---
    batch_ix = jnp.arange(B)[:, None]
    x_sel = x_feat[batch_ix, topk_idx]                               # (B, cs, H, W)
    xe = x_sel[:, hadamard_i] * x_sel[:, hadamard_j]
    xe = (xe - m_e[None, :, None, None]) / jnp.sqrt(v_e + eps)[None, :, None, None]
    xe = xe * g_e[None, :, None, None] + b_e[None, :, None, None]
    ref = jnp.concatenate([x_feat, xe], axis=1)

    assert out.shape == (B, c1 + cs_expand, H, W)
    max_err = float(jnp.max(jnp.abs(out - ref)))
    assert jnp.allclose(out, ref, atol=1e-4, rtol=1e-5), max_err
    print("KERNEL_OK")
</pallas_src>

<mosaic_0001>
module attributes {stable_mosaic.version = 11 : i64} {
  func.func @kernel(%arg0: i32, %arg1: i32, %arg2: memref<24xi32, #tpu.memory_space<smem>>, %arg3: memref<8x1xf32, #tpu.memory_space<vmem>>, %arg4: memref<8x1xf32, #tpu.memory_space<vmem>>, %arg5: memref<1x8x256xf32, #tpu.memory_space<vmem>>, %arg6: memref<1x14x256xf32, #tpu.memory_space<vmem>>, %arg7: memref<8x256xf32, #tpu.memory_space<vmem>>) attributes {dimension_semantics = [#tpu.dimension_semantics<parallel>, #tpu.dimension_semantics<parallel>], iteration_bounds = array<i64: 2, 1>, scalar_prefetch = 1 : i64, scratch_operands = 1 : i64, tpu.core_type = #tpu.core_type<tc>, window_params = [{pipeline_mode = #tpu.pipeline_mode<synchronous>, transform_indices = @transform_0, window_bounds = array<i64: 8, 1>}, {pipeline_mode = #tpu.pipeline_mode<synchronous>, transform_indices = @transform_1, window_bounds = array<i64: 8, 1>}, {transform_indices = @transform_2, window_bounds = array<i64: 1, 8, 256>}, {transform_indices = @transform_3, window_bounds = array<i64: 1, 14, 256>}]} {
    %c12_i32 = arith.constant 12 : i32
    %0 = arith.muli %arg0, %c12_i32 : i32
    %c0 = arith.constant 0 : index
    %c0_0 = arith.constant 0 : index
    %c0_1 = arith.constant 0 : index
    %1 = vector.load %arg5[%c0, %c0_0, %c0_1] : memref<1x8x256xf32, #tpu.memory_space<vmem>>, vector<1x8x256xf32>
    %2 = vector.shape_cast %1 : vector<1x8x256xf32> to vector<8x256xf32>
    %c0_2 = arith.constant 0 : index
    %c0_3 = arith.constant 0 : index
    %c0_4 = arith.constant 0 : index
    %3 = vector.load %arg6[%c0_2, %c0_3, %c0_4] : memref<1x14x256xf32, #tpu.memory_space<vmem>>, vector<1x8x256xf32>
    %4 = vector.shape_cast %3 : vector<1x8x256xf32> to vector<8x256xf32>
    %5 = vector.shape_cast %2 : vector<8x256xf32> to vector<1x8x256xf32>
    tpu.vector_store %arg6[%c0_2, %c0_3, %c0_4], %5 {strides = array<i32>} : memref<1x14x256xf32, #tpu.memory_space<vmem>>, vector<1x8x256xf32>,
    %c0_i32 = arith.constant 0 : i32
    %6 = arith.addi %0, %c0_i32 : i32
    %7 = arith.index_cast %6 : i32 to index
    %8 = memref.load %arg2[%7] : memref<24xi32, #tpu.memory_space<smem>>
    %c6_i32 = arith.constant 6 : i32
    %9 = arith.addi %0, %c6_i32 : i32
    %c0_i32_5 = arith.constant 0 : i32
    %10 = arith.addi %9, %c0_i32_5 : i32
    %11 = arith.index_cast %10 : i32 to index
    %12 = memref.load %arg2[%11] : memref<24xi32, #tpu.memory_space<smem>>
    %c0_6 = arith.constant 0 : index
    %13 = arith.index_cast %8 : i32 to index
    %c0_7 = arith.constant 0 : index
    %14 = vector.load %arg5[%c0_6, %13, %c0_7] : memref<1x8x256xf32, #tpu.memory_space<vmem>>, vector<1x1x256xf32>
    %15 = vector.shape_cast %14 : vector<1x1x256xf32> to vector<1x256xf32>
    %c0_8 = arith.constant 0 : index
    %16 = arith.index_cast %12 : i32 to index
    %c0_9 = arith.constant 0 : index
    %17 = vector.load %arg5[%c0_8, %16, %c0_9] : memref<1x8x256xf32, #tpu.memory_space<vmem>>, vector<1x1x256xf32>
    %18 = vector.shape_cast %17 : vector<1x1x256xf32> to vector<1x256xf32>
    %19 = arith.mulf %15, %18 : vector<1x256xf32>
    %c0_10 = arith.constant 0 : index
    %c0_11 = arith.constant 0 : index
    %20 = vector.load %arg7[%c0_10, %c0_11] : memref<8x256xf32, #tpu.memory_space<vmem>>, vector<1x256xf32>
    tpu.vector_store %arg7[%c0_10, %c0_11], %19 {strides = array<i32>} : memref<8x256xf32, #tpu.memory_space<vmem>>, vector<1x256xf32>,
    %c1_i32 = arith.constant 1 : i32
    %21 = arith.addi %0, %c1_i32 : i32
    %22 = arith.index_cast %21 : i32 to index
    %23 = memref.load %arg2[%22] : memref<24xi32, #tpu.memory_space<smem>>
    %c6_i32_12 = arith.constant 6 : i32
    %24 = arith.addi %0, %c6_i32_12 : i32
    %c1_i32_13 = arith.constant 1 : i32
    %25 = arith.addi %24, %c1_i32_13 : i32
    %26 = arith.index_cast %25 : i32 to index
    %27 = memref.load %arg2[%26] : memref<24xi32, #tpu.memory_space<smem>>
    %c0_14 = arith.constant 0 : index
    %28 = arith.index_cast %23 : i32 to index
    %c0_15 = arith.constant 0 : index
    %29 = vector.load %arg5[%c0_14, %28, %c0_15] : memref<1x8x256xf32, #tpu.memory_space<vmem>>, vector<1x1x256xf32>
    %30 = vector.shape_cast %29 : vector<1x1x256xf32> to vector<1x256xf32>
    %c0_16 = arith.constant 0 : index
    %31 = arith.index_cast %27 : i32 to index
    %c0_17 = arith.constant 0 : index
    %32 = vector.load %arg5[%c0_16, %31, %c0_17] : memref<1x8x256xf32, #tpu.memory_space<vmem>>, vector<1x1x256xf32>
    %33 = vector.shape_cast %32 : vector<1x1x256xf32> to vector<1x256xf32>
    %34 = arith.mulf %30, %33 : vector<1x256xf32>
    %c1 = arith.constant 1 : index
    %c0_18 = arith.constant 0 : index
    %35 = vector.load %arg7[%c1, %c0_18] : memref<8x256xf32, #tpu.memory_space<vmem>>, vector<1x256xf32>
    tpu.vector_store %arg7[%c1, %c0_18], %34 {strides = array<i32>} : memref<8x256xf32, #tpu.memory_space<vmem>>, vector<1x256xf32>,
    %c2_i32 = arith.constant 2 : i32
    %36 = arith.addi %0, %c2_i32 : i32
    %37 = arith.index_cast %36 : i32 to index
    %38 = memref.load %arg2[%37] : memref<24xi32, #tpu.memory_space<smem>>
    %c6_i32_19 = arith.constant 6 : i32
    %39 = arith.addi %0, %c6_i32_19 : i32
    %c2_i32_20 = arith.constant 2 : i32
    %40 = arith.addi %39, %c2_i32_20 : i32
    %41 = arith.index_cast %40 : i32 to index
    %42 = memref.load %arg2[%41] : memref<24xi32, #tpu.memory_space<smem>>
    %c0_21 = arith.constant 0 : index
    %43 = arith.index_cast %38 : i32 to index
    %c0_22 = arith.constant 0 : index
    %44 = vector.load %arg5[%c0_21, %43, %c0_22] : memref<1x8x256xf32, #tpu.memory_space<vmem>>, vector<1x1x256xf32>
    %45 = vector.shape_cast %44 : vector<1x1x256xf32> to vector<1x256xf32>
    %c0_23 = arith.constant 0 : index
    %46 = arith.index_cast %42 : i32 to index
    %c0_24 = arith.constant 0 : index
    %47 = vector.load %arg5[%c0_23, %46, %c0_24] : memref<1x8x256xf32, #tpu.memory_space<vmem>>, vector<1x1x256xf32>
    %48 = vector.shape_cast %47 : vector<1x1x256xf32> to vector<1x256xf32>
    %49 = arith.mulf %45, %48 : vector<1x256xf32>
    %c2 = arith.constant 2 : index
    %c0_25 = arith.constant 0 : index
    %50 = vector.load %arg7[%c2, %c0_25] : memref<8x256xf32, #tpu.memory_space<vmem>>, vector<1x256xf32>
    tpu.vector_store %arg7[%c2, %c0_25], %49 {strides = array<i32>} : memref<8x256xf32, #tpu.memory_space<vmem>>, vector<1x256xf32>,
    %c3_i32 = arith.constant 3 : i32
    %51 = arith.addi %0, %c3_i32 : i32
    %52 = arith.index_cast %51 : i32 to index
    %53 = memref.load %arg2[%52] : memref<24xi32, #tpu.memory_space<smem>>
    %c6_i32_26 = arith.constant 6 : i32
    %54 = arith.addi %0, %c6_i32_26 : i32
    %c3_i32_27 = arith.constant 3 : i32
    %55 = arith.addi %54, %c3_i32_27 : i32
    %56 = arith.index_cast %55 : i32 to index
    %57 = memref.load %arg2[%56] : memref<24xi32, #tpu.memory_space<smem>>
    %c0_28 = arith.constant 0 : index
    %58 = arith.index_cast %53 : i32 to index
    %c0_29 = arith.constant 0 : index
    %59 = vector.load %arg5[%c0_28, %58, %c0_29] : memref<1x8x256xf32, #tpu.memory_space<vmem>>, vector<1x1x256xf32>
    %60 = vector.shape_cast %59 : vector<1x1x256xf32> to vector<1x256xf32>
    %c0_30 = arith.constant 0 : index
    %61 = arith.index_cast %57 : i32 to index
    %c0_31 = arith.constant 0 : index
    %62 = vector.load %arg5[%c0_30, %61, %c0_31] : memref<1x8x256xf32, #tpu.memory_space<vmem>>, vector<1x1x256xf32>
    %63 = vector.shape_cast %62 : vector<1x1x256xf32> to vector<1x256xf32>
    %64 = arith.mulf %60, %63 : vector<1x256xf32>
    %c3 = arith.constant 3 : index
    %c0_32 = arith.constant 0 : index
    %65 = vector.load %arg7[%c3, %c0_32] : memref<8x256xf32, #tpu.memory_space<vmem>>, vector<1x256xf32>
    tpu.vector_store %arg7[%c3, %c0_32], %64 {strides = array<i32>} : memref<8x256xf32, #tpu.memory_space<vmem>>, vector<1x256xf32>,
    %c4_i32 = arith.constant 4 : i32
    %66 = arith.addi %0, %c4_i32 : i32
    %67 = arith.index_cast %66 : i32 to index
    %68 = memref.load %arg2[%67] : memref<24xi32, #tpu.memory_space<smem>>
    %c6_i32_33 = arith.constant 6 : i32
    %69 = arith.addi %0, %c6_i32_33 : i32
    %c4_i32_34 = arith.constant 4 : i32
    %70 = arith.addi %69, %c4_i32_34 : i32
    %71 = arith.index_cast %70 : i32 to index
    %72 = memref.load %arg2[%71] : memref<24xi32, #tpu.memory_space<smem>>
    %c0_35 = arith.constant 0 : index
    %73 = arith.index_cast %68 : i32 to index
    %c0_36 = arith.constant 0 : index
    %74 = vector.load %arg5[%c0_35, %73, %c0_36] : memref<1x8x256xf32, #tpu.memory_space<vmem>>, vector<1x1x256xf32>
    %75 = vector.shape_cast %74 : vector<1x1x256xf32> to vector<1x256xf32>
    %c0_37 = arith.constant 0 : index
    %76 = arith.index_cast %72 : i32 to index
    %c0_38 = arith.constant 0 : index
    %77 = vector.load %arg5[%c0_37, %76, %c0_38] : memref<1x8x256xf32, #tpu.memory_space<vmem>>, vector<1x1x256xf32>
    %78 = vector.shape_cast %77 : vector<1x1x256xf32> to vector<1x256xf32>
    %79 = arith.mulf %75, %78 : vector<1x256xf32>
    %c4 = arith.constant 4 : index
    %c0_39 = arith.constant 0 : index
    %80 = vector.load %arg7[%c4, %c0_39] : memref<8x256xf32, #tpu.memory_space<vmem>>, vector<1x256xf32>
    tpu.vector_store %arg7[%c4, %c0_39], %79 {strides = array<i32>} : memref<8x256xf32, #tpu.memory_space<vmem>>, vector<1x256xf32>,
    %c5_i32 = arith.constant 5 : i32
    %81 = arith.addi %0, %c5_i32 : i32
    %82 = arith.index_cast %81 : i32 to index
    %83 = memref.load %arg2[%82] : memref<24xi32, #tpu.memory_space<smem>>
    %c6_i32_40 = arith.constant 6 : i32
    %84 = arith.addi %0, %c6_i32_40 : i32
    %c5_i32_41 = arith.constant 5 : i32
    %85 = arith.addi %84, %c5_i32_41 : i32
    %86 = arith.index_cast %85 : i32 to index
    %87 = memref.load %arg2[%86] : memref<24xi32, #tpu.memory_space<smem>>
    %c0_42 = arith.constant 0 : index
    %88 = arith.index_cast %83 : i32 to index
    %c0_43 = arith.constant 0 : index
    %89 = vector.load %arg5[%c0_42, %88, %c0_43] : memref<1x8x256xf32, #tpu.memory_space<vmem>>, vector<1x1x256xf32>
    %90 = vector.shape_cast %89 : vector<1x1x256xf32> to vector<1x256xf32>
    %c0_44 = arith.constant 0 : index
    %91 = arith.index_cast %87 : i32 to index
    %c0_45 = arith.constant 0 : index
    %92 = vector.load %arg5[%c0_44, %91, %c0_45] : memref<1x8x256xf32, #tpu.memory_space<vmem>>, vector<1x1x256xf32>
    %93 = vector.shape_cast %92 : vector<1x1x256xf32> to vector<1x256xf32>
    %94 = arith.mulf %90, %93 : vector<1x256xf32>
    %c5 = arith.constant 5 : index
    %c0_46 = arith.constant 0 : index
    %95 = vector.load %arg7[%c5, %c0_46] : memref<8x256xf32, #tpu.memory_space<vmem>>, vector<1x256xf32>
    tpu.vector_store %arg7[%c5, %c0_46], %94 {strides = array<i32>} : memref<8x256xf32, #tpu.memory_space<vmem>>, vector<1x256xf32>,
    %c0_47 = arith.constant 0 : index
    %c0_48 = arith.constant 0 : index
    %96 = vector.load %arg7[%c0_47, %c0_48] : memref<8x256xf32, #tpu.memory_space<vmem>>, vector<8x256xf32>
    %c0_49 = arith.constant 0 : index
    %c0_50 = arith.constant 0 : index
    %97 = vector.load %arg3[%c0_49, %c0_50] : memref<8x1xf32, #tpu.memory_space<vmem>>, vector<8x1xf32>
    %98 = vector.broadcast %97 : vector<8x1xf32> to vector<8x256xf32>
    %99 = arith.mulf %96, %98 : vector<8x256xf32>
    %c0_51 = arith.constant 0 : index
    %c0_52 = arith.constant 0 : index
    %100 = vector.load %arg4[%c0_51, %c0_52] : memref<8x1xf32, #tpu.memory_space<vmem>>, vector<8x1xf32>
    %101 = vector.broadcast %100 : vector<8x1xf32> to vector<8x256xf32>
    %102 = arith.addf %99, %101 : vector<8x256xf32>
    %103 = vector.extract_strided_slice %102 {offsets = [0, 0], sizes = [6, 256], strides = [1, 1]} : vector<8x256xf32> to vector<6x256xf32>
    %c0_53 = arith.constant 0 : index
    %c8 = arith.constant 8 : index
    %c0_54 = arith.constant 0 : index
    %104 = vector.load %arg6[%c0_53, %c8, %c0_54] : memref<1x14x256xf32, #tpu.memory_space<vmem>>, vector<1x6x256xf32>
    %105 = vector.shape_cast %104 : vector<1x6x256xf32> to vector<6x256xf32>
    %106 = vector.shape_cast %103 : vector<6x256xf32> to vector<1x6x256xf32>
    tpu.vector_store %arg6[%c0_53, %c8, %c0_54], %106 {strides = array<i32>} : memref<1x14x256xf32, #tpu.memory_space<vmem>>, vector<1x6x256xf32>,
    return
  }
  func.func @transform_0(%arg0: i32, %arg1: i32, %arg2: memref<24xi32, #tpu.memory_space<smem>>) -> (i32, i32) {
    %c0_i32 = arith.constant 0 : i32
    %c0_i32_0 = arith.constant 0 : i32
    %c0_i32_1 = arith.constant 0 : i32
    return %c0_i32, %c0_i32_0 : i32, i32
  }
  func.func @transform_1(%arg0: i32, %arg1: i32, %arg2: memref<24xi32, #tpu.memory_space<smem>>) -> (i32, i32) {
    %c0_i32 = arith.constant 0 : i32
    %c0_i32_0 = arith.constant 0 : i32
    %c0_i32_1 = arith.constant 0 : i32
    return %c0_i32, %c0_i32_0 : i32, i32
  }
  func.func @transform_2(%arg0: i32, %arg1: i32, %arg2: memref<24xi32, #tpu.memory_space<smem>>) -> (i32, i32, i32) {
    %c0_i32 = arith.constant 0 : i32
    %c0_i32_0 = arith.constant 0 : i32
    return %arg0, %c0_i32, %arg1 : i32, i32, i32
  }
  func.func @transform_3(%arg0: i32, %arg1: i32, %arg2: memref<24xi32, #tpu.memory_space<smem>>) -> (i32, i32, i32) {
    %c0_i32 = arith.constant 0 : i32
    %c0_i32_0 = arith.constant 0 : i32
    return %arg0, %c0_i32, %arg1 : i32, i32, i32
  }
}

</mosaic_0001>

<bundles_post_ra>
// kernel: tpu_custom_call.1
= control target key start
LH: loop header
LB: loop body
LE: loop exit
PB: predicated region body
PF: predicated region fallthrough
CT: control target
= control target key end

     0   :  { %s990_s0 = inlined_call_operand.vmem [shape: s32[24], index: 0, kind: input, shape index: {}]   ;;  %s991_s1 = inlined_call_operand.vmem [shape: f32[8,1], index: 1, kind: input, shape index: {}]   ;;  %s992_s2 = inlined_call_operand.vmem [shape: f32[8,1], index: 2, kind: input, shape index: {}]   ;;  %s993_s3 = inlined_call_operand.hbm [shape: f32[2,8,256], index: 3, kind: input, shape index: {}]   ;;  %s994_s4 = inlined_call_operand.vmem [shape: f32[2,14,256], index: 4, kind: output, shape index: {}]  }
   0x1   :  { %997 = sst [smem:[#allocation12_spill]] %s991_s1  ;;  %s9_s17 = sshll.u32 %s990_s0, 4  ;;  %s10_s17 = int_to_ptr.vmem [resolvable:$true] %s9_s17 }
   0x2   :  { %998 = sst [smem:[#allocation13_spill]] %s993_s3  ;;  %s647_s18 = scalar_lea.vmem %s10_s17, 16 }
   0x3   :  { %p648_p0 = scmp.ne.s32.totalorder %s10_s17, %s647_s18  ;;  %p652_p1 = scmp.lt.s32.totalorder %s10_s17, %s10_s17 }
   0x4   :  { %p653_p2 = scmp.lt.s32.totalorder %s647_s18, %s647_s18 }
   0x6   :  { %p654_p3 = por %p653_p2, %p652_p1 }
   0x8   :  { %p655_p4 = pnand %p654_p3, %p648_p0 }
   0xa   :  { %658 = shalt.err (!%p655_p4)  }
   0xb   :  { %s743_s19 = smov [#allocation4]  }
   0xc   :  { %12 = dma.vmem_to_smem %s10_s17, 16, %s743_s19, [#allocation3] }
   0xd   :  { %713 = dma.done.wait [#allocation3], 16 }
   0xe   :  { %714 = vsyncadd [#allocation3], 4294967280 }
   0xf   :  { %14 = sfence }
  0x10   :  { %15 = vsyncpa [#allocation6], 0 }
  0x11   :  { %17 = vsyncpa [#allocation6 + $0x1], 0  ;;  %s774_s20 = smov 0   ;;  %s776_s21 = smov 0  }
  0x12   :  { %s778_s0 = smov 0   ;;  %s780_s22 = smov 0  }
  0x13   :  { %s782_s23 = smov 0   ;;  %s784_s24 = smov 0  }
  0x14 LB: > { %999 = sst [smem:[#allocation9_spill]] %s737_s23  ;;  %s538_s25 = sadd.s32 4294967295, %s741_s24   ;;  %s741_s24 = sphi %s784_s24, %s23_s24   ;;  %s737_s23 = sphi %s782_s23, %s1014_s23   ;;  %s733_s22 = sphi %s780_s22, %s1018_s22   ;;  %s729_s0 = sphi %s778_s0, %s1017_s0   ;;  %s725_s21 = sphi %s776_s21, %s1016_s21   ;;  %s721_s20 = sphi %s774_s20, %s1015_s20  }
  0x15   : > { %s35_s26 = sadd.s32 1, %s737_s23  ;;  %s86_s27 = sadd.s32 1, %s729_s0 }
  0x16   : > { %p37_p5 = scmp.ge.s32.totalorder %s35_s26, 2  ;;  %p93_p6 = scmp.ne.s32.totalorder %s729_s0, %s725_s21 }
  0x17   : > { %p94_p7 = scmp.eq.s32.totalorder %s741_s24, 0  ;;  %p99_p9 = scmp.ne.s32.totalorder %s725_s21, %s721_s20 }
  0x18   : > { %s1020_s26 = smov (%p37_p5, %s35_s26), 0  ;;  %p100_p10 = scmp.eq.s32.totalorder %s538_s25, 0 }
  0x19   : > { %1000 = sst [smem:[#allocation10_spill]] %s1020_s26  ;;  %p810_p8 = por %p94_p7, %p93_p6 }
  0x1a   : > { %s81_s29 = ssub.s32 %s737_s23, %s1020_s26  ;;  %p817_p12 = por %p100_p10, %p99_p9 }
  0x1b   : > { %p84_p11 = scmp.eq.s32.totalorder %s81_s29, 0  ;;  %p595_p13 = scmp.lt.s32.totalorder %s741_s24, 2 }
  0x1c   : > { %s157_s6 = sand.u32 1, %s729_s0   ;;  %s575_s7 = sshll.u32 %s737_s23, 8 }
  0x1d   : > { %s823_s5 = scalar_select %p84_p11, %s729_s0, %s86_s27  }
  0x1e   : > { %s542_s8 = sshll.u32 %s157_s6, 4  ;;  %s1004_s3 = sld [smem:[#allocation13_spill]] }
  0x1f   : > { %1003 = sst [smem:[#allocation11_spill]] %s823_s5  ;;  %s161_s12 = scalar_lea.vmem [#allocation5], %s542_s8 }
  0x20   : > { %s171_s13 = sshll.u32 %s161_s12, 4  ;;  %p834_p0 = pnand %p595_p13, %p810_p8  ;;  %s838_s13 = int_to_ptr.vmem [resolvable:$true] %s171_s13 }
  0x21   : > { %s158_s15 = scalar_lea.sflag [#allocation6], %s157_s6 }
  0x22   : > { %p661_p4 = pneg %p834_p0 }
  0x24   : > { %s830_s11 = scalar_lea.hbm %s1004_s3, %s575_s7  ;;  %s664_s19 = scalar_lea.hbm %s1004_s3, 512 }
  0x25   : > { %s659_s16 = scalar_lea.hbm %s830_s11, 256  ;;  %p665_p7 = scmp.lt.u32.totalorder %s830_s11, %s1004_s3 }
  0x26   : > { %p660_p3 = scmp.ne.s32.totalorder %s830_s11, %s659_s16  ;;  %p666_p8 = scmp.lt.u32.totalorder %s664_s19, %s659_s16 }
  0x27   : > { %p668_p10 = scmp.lt.u32.totalorder %s659_s16, %s830_s11 }
  0x28   : > { %p662_p5 = pnand %p661_p4, %p660_p3  ;;  %p667_p9 = por %p666_p8, %p665_p7 }
  0x2a   : > { %p663_p6 = pneg %p662_p5  ;;  %p669_p11 = por %p668_p10, %p667_p9 }
  0x2c   : > { %p670_p13 = pnand %p669_p11, %p663_p6 }
  0x2e   : > { %673 = shalt.err (!%p670_p13)
}
  0x2f   : > { %s674_s27 = scalar_lea.vmem %s838_s13, 256  ;;  %s744_s28 = smov [#allocation5]  }
  0x30   : > { %p675_p3 = scmp.ne.s32.totalorder %s838_s13, %s674_s27  ;;  %s679_s29 = sshll.u32 %s744_s28, 4  ;;  %s680_s29 = int_to_ptr.vmem [resolvable:$false] %s679_s29 }
  0x31   : > { %s681_s6 = scalar_lea.vmem %s680_s29, 512  ;;  %p682_p2 = scmp.lt.s32.totalorder %s838_s13, %s680_s29 }
  0x32   : > { %p677_p5 = pnand %p675_p3, %p661_p4  ;;  %p683_p7 = scmp.lt.s32.totalorder %s681_s6, %s674_s27 }
  0x34   : > { %p678_p1 = pneg %p677_p5  ;;  %p684_p8 = por %p683_p7, %p682_p2 }
  0x36   : > { %p685_p9 = pnand %p684_p8, %p678_p1 }
  0x38   : > { %688 = shalt.err (!%p685_p9)
}
  0x39   : > { %594 = dma.hbm_to_vmem [thread:$0]  (!%p834_p0), %s830_s11, 256, %s838_s13, %s158_s15  }
  0x3a   : > { %p1006_p6 = scmp.lt.s32.totalorder %s741_s24, 3  ;;  %p1007_p10 = scmp.ge.s32.totalorder %s741_s24, 1 }
  0x3c   : > { %p177_p4 = pnand %p1007_p10, %p1006_p6 }
  0x3d   : > { %s182_s7 = sand.u32 (!%p177_p4), 1, %s725_s21  }
  0x3e   : > { %180 = sbr.rel (%p177_p4) target bundleno = 212 (0xd4), region = 32  ;;  %s546_s8 = sshll.u32 (!%p177_p4), %s182_s7, 4 }
  0x3f   : > { %s183_s9 = scalar_lea.sflag (!%p177_p4), [#allocation6], %s182_s7  ;;  %s872_s10 = scalar_lea.vmem (!%p177_p4), [#allocation5], %s546_s8 }
  0x45   : > { %716 = dma.done.wait (%p817_p12), %s183_s9, 256  }
  0x46   : > { %718 = vsyncadd (%p817_p12), %s183_s9, 4294967040  ;;  %s879_s12 = smul.u32 12, %s733_s22  ;;  %v745_v0 = vmov 0   ;;  %s1008_s1 = sld [smem:[#allocation12_spill]]  ;;  %v397_v2 = vld [vmem:[%s992_s2] sm:$0xff]  ;;  %v251_v3 = vlaneseq  ;;  %v226_v21 = vld [vmem:[%s872_s10 + $0x8] sm:$0xff] }
  0x47   : > { %646 = vset.pattern.permute.xlu0 %v745_v0  ;;  %p215_p12 = scmp.lt.s32.totalorder %s733_s22, 1  ;;  %v225_v20 = vld [vmem:[%s872_s10] sm:$0xff] }
  0x48   : > { %s230_s11 = sadd.s32 6, %s879_s12  ;;  %s257_s30 = sadd.s32 1, %s879_s12  ;;  %vm921_vm0 = vcmp.lt.s32.totalorder %v251_v3, 256 }
  0x49   : > { %s259_s13 = sadd.s32 7, %s879_s12  ;;  %s283_s14 = sadd.s32 2, %s879_s12 }
  0x4a   : > { %s285_s15 = sadd.s32 8, %s879_s12  ;;  %s309_s16 = sadd.s32 3, %s879_s12 }
  0x4b   : > { %s311_s17 = sadd.s32 9, %s879_s12  ;;  %s335_s18 = sadd.s32 4, %s879_s12 }
  0x4c   : > { %s337_s19 = sadd.s32 10, %s879_s12  ;;  %s361_s20 = sadd.s32 5, %s879_s12  ;;  %v389_v1 = vld [vmem:[%s1008_s1] sm:$0xff] }
  0x4d   : > { %s229_s29 = sld [smem:[#allocation4 + %s879_s12]]  ;;  %392 = vperm.xlu0 %646, %v389_v1   ;;  %s1022_s22 = smov (!%p215_p12, %s733_s22), 1 }
  0x4e   : > { %s231_s6 = sld [smem:[#allocation4 + %s230_s11]] }
  0x4f   : > { %s896_s7 = sld [smem:[#allocation4 + %s257_s30]] }
  0x50   : > { %s901_s3 = sld [smem:[#allocation4 + %s259_s13]] }
  0x51   : > { %s903_s26 = sld [smem:[#allocation4 + %s283_s14]]  ;;  %400 = vperm.xlu0 %646, %v397_v2  }
  0x52   : > { %s905_s23 = sld [smem:[#allocation4 + %s285_s15]] }
  0x53   : > { %s907_s5 = sld [smem:[#allocation4 + %s309_s16]]  ;;  %s232_s13 = sshra.s32 %s229_s29, 3 }
  0x54   : > { %s909_s25 = sld [smem:[#allocation4 + %s311_s17]]  ;;  %s235_s8 = sand.u32 7, %s229_s29 }
  0x55   : > { %s911_s27 = sld [smem:[#allocation4 + %s335_s18]]  ;;  %s577_s14 = sshll.u32 %s232_s13, 4 }
  0x56   : > { %s913_s11 = sld [smem:[#allocation4 + %s337_s19]]  ;;  %s241_s15 = sshra.s32 %s231_s6, 3 }
  0x57   : > { %s915_s30 = sld [smem:[#allocation4 + %s361_s20]]  ;;  %s238_s16 = sadd.s32 %s577_s14, %s235_s8 }
  0x58   : > { %s244_s17 = sand.u32 7, %s231_s6  ;;  %s239_s9 = scalar_lea.vmem %s872_s10, %s238_s16 [#allocation5] }
  0x59   : > { %s578_s18 = sshll.u32 %s241_s15, 4  ;;  %v240_v4 = vld [vmem:[%s239_s9] ss:$8 sm:$0x3]  ;;  %s261_s1 = sshra.s32 %s896_s7, 3 }
  0x5a   : > { %s247_s28 = sadd.s32 %s578_s18, %s244_s17  ;;  %s264_s20 = sand.u32 7, %s896_s7 }
  0x5b   : > { %s248_s19 = scalar_lea.vmem %s872_s10, %s247_s28 [#allocation5]  ;;  %s579_s29 = sshll.u32 %s261_s1, 4 }
  0x5c   : > { %v249_v6 = vld [vmem:[%s248_s19] ss:$8 sm:$0x3]  ;;  %s270_s13 = sshra.s32 %s901_s3, 3  ;;  %s267_s6 = sadd.s32 %s579_s29, %s264_s20 }
  0x5d   : > { %v250_v7 = vmul.f32 %v249_v6, %v240_v4  ;;  %s273_s8 = sand.u32 7, %s901_s3  ;;  %s268_s14 = scalar_lea.vmem %s872_s10, %s267_s6 [#allocation5] }
  0x5e   : > { %s580_s15 = sshll.u32 %s270_s13, 4  ;;  %v269_v8 = vld [vmem:[%s268_s14] ss:$8 sm:$0x3]  ;;  %s287_s7 = sshra.s32 %s903_s26, 3 }
  0x5f   : > { %255 = vst.msk [vmem:[#allocation2] ss:$8 sm:$0x3] %vm921_vm0, %v250_v7  ;;  %s276_s28 = sadd.s32 %s580_s15, %s273_s8  ;;  %s290_s17 = sand.u32 7, %s903_s26 }
  0x60   : > { %s277_s16 = scalar_lea.vmem %s872_s10, %s276_s28 [#allocation5]  ;;  %s581_s1 = sshll.u32 %s287_s7, 4 }
  0x61   : > { %v278_v9 = vld [vmem:[%s277_s16] ss:$8 sm:$0x3]  ;;  %s296_s9 = sshra.s32 %s905_s23, 3  ;;  %s293_s3 = sadd.s32 %s581_s1, %s290_s17 }
  0x62   : > { %v279_v10 = vmul.f32 %v278_v9, %v269_v8  ;;  %s299_s18 = sand.u32 7, %s905_s23  ;;  %s294_s19 = scalar_lea.vmem %s872_s10, %s293_s3 [#allocation5] }
  0x63   : > { %s582_s20 = sshll.u32 %s296_s9, 4  ;;  %v295_v11 = vld [vmem:[%s294_s19] ss:$8 sm:$0x3]  ;;  %s313_s13 = sshra.s32 %s907_s5, 3 }
  0x64   : > { %281 = vst.msk [vmem:[#allocation2 + $0x1] ss:$8 sm:$0x3] %vm921_vm0, %v279_v10  ;;  %s302_s29 = sadd.s32 %s582_s20, %s299_s18  ;;  %s316_s6 = sand.u32 7, %s907_s5 }
  0x65   : > { %s303_s26 = scalar_lea.vmem %s872_s10, %s302_s29 [#allocation5]  ;;  %s583_s8 = sshll.u32 %s313_s13, 4 }
  0x66   : > { %v304_v12 = vld [vmem:[%s303_s26] ss:$8 sm:$0x3]  ;;  %s322_s14 = sshra.s32 %s909_s25, 3  ;;  %s319_s23 = sadd.s32 %s583_s8, %s316_s6 }
  0x67   : > { %v305_v13 = vmul.f32 %v304_v12, %v295_v11  ;;  %s325_s15 = sand.u32 7, %s909_s25  ;;  %s320_s28 = scalar_lea.vmem %s872_s10, %s319_s23 [#allocation5] }
  0x68   : > { %s584_s7 = sshll.u32 %s322_s14, 4  ;;  %v321_v14 = vld [vmem:[%s320_s28] ss:$8 sm:$0x3]  ;;  %s339_s17 = sshra.s32 %s911_s27, 3 }
  0x69   : > { %307 = vst.msk [vmem:[#allocation2 + $0x2] ss:$8 sm:$0x3] %vm921_vm0, %v305_v13  ;;  %s328_s16 = sadd.s32 %s584_s7, %s325_s15  ;;  %s342_s1 = sand.u32 7, %s911_s27 }
  0x6a   : > { %s329_s5 = scalar_lea.vmem %s872_s10, %s328_s16 [#allocation5]  ;;  %s585_s9 = sshll.u32 %s339_s17, 4 }
  0x6b   : > { %v330_v15 = vld [vmem:[%s329_s5] ss:$8 sm:$0x3]  ;;  %s348_s3 = sshra.s32 %s913_s11, 3  ;;  %s345_s25 = sadd.s32 %s585_s9, %s342_s1 }
  0x6c   : > { %v331_v16 = vmul.f32 %v330_v15, %v321_v14  ;;  %s351_s18 = sand.u32 7, %s913_s11  ;;  %s346_s19 = scalar_lea.vmem %s872_s10, %s345_s25 [#allocation5] }
  0x6d   : > { %s586_s20 = sshll.u32 %s348_s3, 4  ;;  %v347_v17 = vld [vmem:[%s346_s19] ss:$8 sm:$0x3]  ;;  %s1011_s13 = sadd.s32 11, %s879_s12 }
  0x6e   : > { %333 = vst.msk [vmem:[#allocation2 + $0x3] ss:$8 sm:$0x3] %vm921_vm0, %v331_v16  ;;  %s354_s29 = sadd.s32 %s586_s20, %s351_s18  ;;  %s364_s27 = sld [smem:[#allocation4 + %s1011_s13]] }
  0x6f   : > { %s355_s26 = scalar_lea.vmem %s872_s10, %s354_s29 [#allocation5]  ;;  %s365_s6 = sshra.s32 %s915_s30, 3 }
  0x70   : > { %v356_v18 = vld [vmem:[%s355_s26] ss:$8 sm:$0x3]  ;;  %s368_s8 = sand.u32 7, %s915_s30  ;;  %s587_s14 = sshll.u32 %s365_s6, 4 }
  0x71   : > { %v357_v19 = vmul.f32 %v356_v18, %v347_v17  ;;  %s371_s11 = sadd.s32 %s587_s14, %s368_s8  ;;  %s576_s7 = sshll.u32 %s1022_s22, 5 }
  0x72   : > { %s372_s23 = scalar_lea.vmem %s872_s10, %s371_s11 [#allocation5]  ;;  %s222_s5 = scalar_lea.vmem %s994_s4, %s576_s7 }
  0x73   : > { %359 = vst.msk [vmem:[#allocation2 + $0x4] ss:$8 sm:$0x3] %vm921_vm0, %v357_v19  ;;  %v373_v22 = vld [vmem:[%s372_s23] ss:$8 sm:$0x3]  ;;  %227 = vst [vmem:[%s222_s5] sm:$0xff] %v225_v20 }
  0x74   : > { %s374_s15 = sshra.s32 %s364_s27, 3  ;;  %s377_s28 = sand.u32 7, %s364_s27  ;;  %228 = vst [vmem:[%s222_s5 + $0x8] sm:$0xff] %v226_v21 }
  0x75   : > { %s588_s12 = sshll.u32 %s374_s15, 4 }
  0x76   : > { %s380_s16 = sadd.s32 %s588_s12, %s377_s28 }
  0x77   : > { %s381_s1 = scalar_lea.vmem %s872_s10, %s380_s16 [#allocation5] }
  0x78   : > { %v382_v23 = vld [vmem:[%s381_s1] ss:$8 sm:$0x3] }
  0x79   : > { %v383_v24 = vmul.f32 %v382_v23, %v373_v22 }
  0x7b   : > { %385 = vst.msk [vmem:[#allocation2 + $0x5] ss:$8 sm:$0x3] %vm921_vm0, %v383_v24 }
  0x82   : > { %v387_v26 = vld [vmem:[#allocation2] sm:$0xff]  ;;  %v388_v27 = vld [vmem:[#allocation2 + $0x8] sm:$0xff] }
  0xcc   : > { %v393_v25 = vpop.permute.xlu0 %392 }
  0xcd   : > { %v395_v28 = vmul.f32 %v393_v25, %v387_v26  ;;  %v396_v29 = vmul.f32 %v393_v25, %v388_v27 }
  0xd0   : > { %v401_v30 = vpop.permute.xlu0 %400 }
  0xd1   : > { %v403_v31 = vadd.f32 %v401_v30, %v395_v28  ;;  %v404_v32 = vadd.f32 %v401_v30, %v396_v29 }
  0xd3   : > { %405 = vst [vmem:[%s222_s5 + $0x10] sm:$0x3f] %v403_v31  ;;  %406 = vst [vmem:[%s222_s5 + $0x18] sm:$0x3f] %v404_v32 }
  0xd4 PF: > { %s23_s24 = sadd.s32 1, %s741_s24   ;;  %s1012_s22 = sld [smem:[#allocation11_spill]] }
  0xd5   : > { %p20_p0 = scmp.ge.s32.totalorder %s23_s24, 4   ;;  %s1013_s10 = sld [smem:[#allocation9_spill]] }
  0xd6   : > { %s1014_s23 = sld [smem:[#allocation10_spill]]  ;;  %s1015_s20 = smov %s725_s21 }
  0xd7   : > { %s1016_s21 = smov %s729_s0  ;;  %22 = sbr.rel (!%p20_p0) target bundleno = 20 (0x14), region = 89 }
  0xda   : > { %s1017_s0 = smov %s1012_s22 }
  0xdb   : > { %s1018_s22 = smov %s1013_s10 }
  0xde   :  { %437 = vsyncpa [#allocation6], 1 }
  0xdf   :  { %439 = vsyncpa [#allocation6 + $0x1], 1 }

</bundles_post_ra>
